<compile_context>
chip_gen: v7x
topology: tpu7x:2x2x1
jax: 0.10.0
libtpu: 0.0.40
codegen_flags: <defaults>
</compile_context>

<pallas_src>
import functools

import jax
import jax.numpy as jnp
from jax.experimental import pallas as pl
from jax.experimental.pallas import tpu as pltpu

_PAIRWISE_EPS = 1e-6  # PyTorch F.pairwise_distance default eps


def _pair_loss(sq_dist, y, margin):
    """(1-y)*d^2 + y*clamp(margin-d, 0)^2, fused as sq + y*(hinge^2 - sq)."""
    dist = jnp.sqrt(sq_dist)                       # EUP slot
    hinge = jnp.maximum(margin - dist, 0.0)
    return sq_dist + y * (hinge * hinge - sq_dist)


def _contrastive_tile_kernel(o1_ref, o2_ref, label_ref, out_ref, *,
                             margin, feat, pack, n_valid_last, mask_last):
    # Upcast in-register; native-dtype inputs keep HBM traffic at native width.
    o1 = o1_ref[...].astype(jnp.float32)           # (TM, pack*feat)
    o2 = o2_ref[...].astype(jnp.float32)
    diff = o1 - o2 + _PAIRWISE_EPS                 # eps added per element (PyTorch)
    sq = diff * diff

    y_all = label_ref[...].astype(jnp.float32)     # (TM, pack)

    if pack == 1:
        sq_dist = jnp.sum(sq, axis=-1, keepdims=True)          # (TM, 1) lane reduce (XLU)
        per_row = _pair_loss(sq_dist, y_all, margin)            # (TM, 1)
    else:
        # Lane-packed layout: original row (p*pack + g) lives in lanes [g*feat,(g+1)*feat)
        # of packed row p.  Unrolled static slices -> exact f32 group sums.
        per_row = None
        for g in range(pack):
            sq_g = jnp.sum(sq[:, g * feat:(g + 1) * feat], axis=-1, keepdims=True)
            y_g = y_all[:, g:g + 1]
            loss_g = _pair_loss(sq_g, y_g, margin)
            per_row = loss_g if per_row is None else per_row + loss_g   # (TM, 1)

    def _write(vals):
        # Lane-dense (1,128) partial block: unmasked store, 512 B writeback per tile.
        out_ref[...] = jnp.full((1, 128), jnp.sum(vals), dtype=jnp.float32)

    if mask_last:
        is_last = pl.program_id(0) == pl.num_programs(0) - 1

        @pl.when(jnp.logical_not(is_last))
        def _():
            _write(per_row)

        @pl.when(is_last)
        def _():
            # Padded rows hold unspecified data; select (never multiply) so NaN/inf
            # in the padding cannot propagate into the sum.
            rid = jax.lax.broadcasted_iota(jnp.int32, per_row.shape, 0)
            _write(jnp.where(rid < n_valid_last, per_row, 0.0))
    else:
        _write(per_row)


def _vmem_physical_bytes():
    """Physical VMEM of this generation (conservative 64 MiB fallback == v7x per-TC)."""
    try:
        info = pltpu.get_tpu_info()
        for name in ("vmem_capacity_bytes", "vmem_bytes", "vmem_size_bytes"):
            v = getattr(info, name, None)
            if v:
                return int(v)
    except Exception:
        pass
    return 64 * 1024 * 1024


def _per_row_vmem_bytes(lane_cols, in_itemsize, n_buffers=2):
    """Estimated resident VMEM per tile row: pipeline buffers + f32 temporaries."""
    input_bufs = 2 * n_buffers * lane_cols * in_itemsize   # o1/o2 double-buffered blocks
    label_bufs = n_buffers * 128 * 4                       # (TM, pack) pads to 128 lanes
    dense_tmp = 3 * lane_cols * 4                          # f32 upcast / diff / sq
    col_tmp = 6 * 128 * 4                                  # (TM, *) column temporaries
    return input_bufs + label_bufs + dense_tmp + col_tmp


def _pick_tile_rows(n_rows, lane_cols, in_itemsize, budget_bytes, max_tile_rows=None):
    tm = max(1, budget_bytes // _per_row_vmem_bytes(lane_cols, in_itemsize))
    if max_tile_rows is not None:
        tm = min(tm, max_tile_rows)
    if tm >= n_rows:
        return n_rows                     # single tile; full-extent block dim is allowed
    tm = max(8, (tm // 8) * 8)            # non-full tiles keep the sublane dim % 8 == 0
    return min(tm, n_rows)


def contrastive_loss(output1, output2, label, margin=2.0, *, max_tile_rows=None):
    """output1, output2: (B, D) float32/bfloat16; label: (B,) any numeric dtype.

    `max_tile_rows` exists only to force multi-tile grids in tests at small shapes.
    """
    B, D = output1.shape
    assert output2.shape == (B, D) and label.shape[0] == B

    # Small-D lane packing: view `pack` consecutive rows as one 128-lane packed row.
    pack = 1
    if D < 128 and D >= 8 and 128 % D == 0 and B % (128 // D) == 0:
        pack = 128 // D
    rows, cols = B // pack, D * pack

    o1 = output1.reshape(rows, cols)      # free for contiguous row-major arrays
    o2 = output2.reshape(rows, cols)
    lab = label.reshape(rows, pack)       # native dtype; cast happens in-kernel

    in_itemsize = jnp.dtype(output1.dtype).itemsize
    label_itemsize = jnp.dtype(label.dtype).itemsize
    lane_cols = pl.cdiv(cols, 128) * 128

    phys_vmem = _vmem_physical_bytes()
    budget = phys_vmem // 2               # resident-bytes budget used for tile sizing
    vmem_limit = (phys_vmem * 3) // 4     # explicit scoped-VMEM limit, with headroom

    tm = _pick_tile_rows(rows, lane_cols, in_itemsize, budget, max_tile_rows)
    num_tiles = pl.cdiv(rows, tm)
    n_valid_last = rows - (num_tiles - 1) * tm
    mask_last = n_valid_last != tm        # static: only the last tile pays for masking

    kernel = functools.partial(
        _contrastive_tile_kernel,
        margin=float(margin), feat=D, pack=pack,
        n_valid_last=n_valid_last, mask_last=mask_last)

    cost = pl.CostEstimate(
        flops=4 * B * D + 10 * B,
        transcendentals=B,                # one sqrt per row
        bytes_accessed=2 * B * D * in_itemsize + B * label_itemsize + num_tiles * 512,
    )

    partials = pl.pallas_call(
        kernel,
        out_shape=jax.ShapeDtypeStruct((1, num_tiles * 128), jnp.float32),
        grid=(num_tiles,),
        in_specs=[
            pl.BlockSpec((tm, cols), lambda i: (i, 0)),   # o1 tile (native dtype)
            pl.BlockSpec((tm, cols), lambda i: (i, 0)),   # o2 tile (native dtype)
            pl.BlockSpec((tm, pack), lambda i: (i, 0)),   # label tile (native dtype)
        ],
        out_specs=pl.BlockSpec((1, 128), lambda i: (0, i)),
        compiler_params=pltpu.CompilerParams(
            dimension_semantics=("parallel",),            # batch tiles are independent
            vmem_limit_bytes=int(vmem_limit)),
        cost_estimate=cost,
    )(o1, o2, lab)

    # Each (1,128) block holds its tile-sum broadcast over 128 lanes; lane 0 suffices.
    tile_sums = partials.reshape(num_tiles, 128)[:, 0]
    return jnp.sum(tile_sums) / jnp.float32(B)


def _reference(output1, output2, label, margin=2.0):
    o1 = output1.astype(jnp.float32)
    o2 = output2.astype(jnp.float32)
    diff = o1 - o2 + _PAIRWISE_EPS
    d = jnp.sqrt(jnp.sum(diff * diff, axis=-1))
    y = label.astype(jnp.float32)
    return jnp.mean((1.0 - y) * d * d + y * jnp.square(jnp.maximum(margin - d, 0.0)))


if __name__ == "__main__":
    key = jax.random.PRNGKey(0)
    ks = jax.random.split(key, 12)

    # 1) Small siamese-embedding shape; exercises the small-D lane-packing path
    #    (D=32 -> pack=4 rows per 128-lane packed row), single tile.
    B, D = 8, 32
    o1 = jax.random.normal(ks[0], (B, D), dtype=jnp.float32)
    o2 = jax.random.normal(ks[1], (B, D), dtype=jnp.float32)
    y = jax.random.bernoulli(ks[2], 0.5, (B,)).astype(jnp.int32)
    loss = jax.block_until_ready(contrastive_loss(o1, o2, y, margin=2.0))
    ref = _reference(o1, o2, y, margin=2.0)
    assert jnp.allclose(loss, ref, rtol=1e-5, atol=1e-5), (loss, ref)

    # 2) bf16 inputs, D=128 (standard path), batch not a multiple of 8, single tile.
    B2, D2 = 300, 128
    o1b = jax.random.normal(ks[3], (B2, D2), dtype=jnp.bfloat16)
    o2b = jax.random.normal(ks[4], (B2, D2), dtype=jnp.bfloat16)
    y2 = jax.random.bernoulli(ks[5], 0.5, (B2,)).astype(jnp.int32)
    loss2 = jax.block_until_ready(contrastive_loss(o1b, o2b, y2, margin=2.0))
    ref2 = _reference(o1b, o2b, y2, margin=2.0)
    assert jnp.allclose(loss2, ref2, rtol=1e-3, atol=1e-3), (loss2, ref2)

    # 3) Forced small tile -> multi-tile grid + masked remainder on the packed path
    #    (pack=2, 26 packed rows, tiles of 16 -> last tile has 10 valid packed rows).
    B3, D3 = 52, 64
    o1c = jax.random.normal(ks[6], (B3, D3), dtype=jnp.float32)
    o2c = jax.random.normal(ks[7], (B3, D3), dtype=jnp.float32)
    y3 = jax.random.bernoulli(ks[8], 0.5, (B3,)).astype(jnp.float32)
    loss3 = jax.block_until_ready(
        contrastive_loss(o1c, o2c, y3, margin=2.0, max_tile_rows=16))
    ref3 = _reference(o1c, o2c, y3, margin=2.0)
    assert jnp.allclose(loss3, ref3, rtol=1e-5, atol=1e-5), (loss3, ref3)

    # 4) Standard path (D=48 does not divide 128), multi-tile + masked remainder
    #    (tiles of 32 over 70 rows -> last tile has 6 valid rows).
    B4, D4 = 70, 48
    o1d = jax.random.normal(ks[9], (B4, D4), dtype=jnp.float32)
    o2d = jax.random.normal(ks[10], (B4, D4), dtype=jnp.float32)
    y4 = jax.random.bernoulli(ks[11], 0.5, (B4,)).astype(jnp.int32)
    loss4 = jax.block_until_ready(
        contrastive_loss(o1d, o2d, y4, margin=2.0, max_tile_rows=32))
    ref4 = _reference(o1d, o2d, y4, margin=2.0)
    assert jnp.allclose(loss4, ref4, rtol=1e-5, atol=1e-5), (loss4, ref4)

    print("KERNEL_OK")
</pallas_src>

<mosaic_0001>
module attributes {stable_mosaic.version = 11 : i64} {
  func.func @_contrastive_tile_kernel(%arg0: i32, %arg1: memref<2x128xf32, #tpu.memory_space<vmem>>, %arg2: memref<2x128xf32, #tpu.memory_space<vmem>>, %arg3: memref<2x4xi32, #tpu.memory_space<vmem>>, %arg4: memref<1x128xf32, #tpu.memory_space<vmem>>) attributes {dimension_semantics = [#tpu.dimension_semantics<parallel>], iteration_bounds = array<i64: 1>, scalar_prefetch = 0 : i64, scratch_operands = 0 : i64, tpu.core_type = #tpu.core_type<tc>, window_params = [{transform_indices = @transform_0, window_bounds = array<i64: 2, 128>}, {transform_indices = @transform_1, window_bounds = array<i64: 2, 128>}, {transform_indices = @transform_2, window_bounds = array<i64: 2, 4>}, {transform_indices = @transform_3, window_bounds = array<i64: 1, 128>}]} {
    %c0 = arith.constant 0 : index
    %c0_0 = arith.constant 0 : index
    %0 = vector.load %arg1[%c0, %c0_0] : memref<2x128xf32, #tpu.memory_space<vmem>>, vector<2x128xf32>
    %c0_1 = arith.constant 0 : index
    %c0_2 = arith.constant 0 : index
    %1 = vector.load %arg2[%c0_1, %c0_2] : memref<2x128xf32, #tpu.memory_space<vmem>>, vector<2x128xf32>
    %2 = arith.subf %0, %1 : vector<2x128xf32>
    %cst = arith.constant 9.99999997E-7 : f32
    %3 = vector.broadcast %cst : f32 to vector<2x128xf32>
    %4 = arith.addf %2, %3 : vector<2x128xf32>
    %5 = arith.mulf %4, %4 : vector<2x128xf32>
    %c0_3 = arith.constant 0 : index
    %c0_4 = arith.constant 0 : index
    %6 = vector.load %arg3[%c0_3, %c0_4] : memref<2x4xi32, #tpu.memory_space<vmem>>, vector<2x4xi32>
    %7 = arith.sitofp %6 : vector<2x4xi32> to vector<2x4xf32>
    %8 = vector.extract_strided_slice %5 {offsets = [0, 0], sizes = [2, 32], strides = [1, 1]} : vector<2x128xf32> to vector<2x32xf32>
    %cst_5 = arith.constant dense<0.000000e+00> : vector<2xf32>
    %9 = vector.multi_reduction <add>, %8, %cst_5 [1] : vector<2x32xf32> to vector<2xf32>
    %10 = vector.shape_cast %9 : vector<2xf32> to vector<2x1xf32>
    %11 = vector.extract_strided_slice %7 {offsets = [0, 0], sizes = [2, 1], strides = [1, 1]} : vector<2x4xf32> to vector<2x1xf32>
    %12 = math.sqrt %10 : vector<2x1xf32>
    %cst_6 = arith.constant 2.000000e+00 : f32
    %13 = vector.broadcast %cst_6 : f32 to vector<2x1xf32>
    %14 = arith.subf %13, %12 : vector<2x1xf32>
    %cst_7 = arith.constant 0.000000e+00 : f32
    %15 = vector.broadcast %cst_7 : f32 to vector<2x1xf32>
    %16 = arith.maximumf %14, %15 : vector<2x1xf32>
    %17 = arith.mulf %16, %16 : vector<2x1xf32>
    %18 = arith.subf %17, %10 : vector<2x1xf32>
    %19 = arith.mulf %11, %18 : vector<2x1xf32>
    %20 = arith.addf %10, %19 : vector<2x1xf32>
    %21 = vector.extract_strided_slice %5 {offsets = [0, 32], sizes = [2, 32], strides = [1, 1]} : vector<2x128xf32> to vector<2x32xf32>
    %cst_8 = arith.constant dense<0.000000e+00> : vector<2xf32>
    %22 = vector.multi_reduction <add>, %21, %cst_8 [1] : vector<2x32xf32> to vector<2xf32>
    %23 = vector.shape_cast %22 : vector<2xf32> to vector<2x1xf32>
    %24 = vector.extract_strided_slice %7 {offsets = [0, 1], sizes = [2, 1], strides = [1, 1]} : vector<2x4xf32> to vector<2x1xf32>
    %25 = math.sqrt %23 : vector<2x1xf32>
    %cst_9 = arith.constant 2.000000e+00 : f32
    %26 = vector.broadcast %cst_9 : f32 to vector<2x1xf32>
    %27 = arith.subf %26, %25 : vector<2x1xf32>
    %cst_10 = arith.constant 0.000000e+00 : f32
    %28 = vector.broadcast %cst_10 : f32 to vector<2x1xf32>
    %29 = arith.maximumf %27, %28 : vector<2x1xf32>
    %30 = arith.mulf %29, %29 : vector<2x1xf32>
    %31 = arith.subf %30, %23 : vector<2x1xf32>
    %32 = arith.mulf %24, %31 : vector<2x1xf32>
    %33 = arith.addf %23, %32 : vector<2x1xf32>
    %34 = arith.addf %20, %33 : vector<2x1xf32>
    %35 = vector.extract_strided_slice %5 {offsets = [0, 64], sizes = [2, 32], strides = [1, 1]} : vector<2x128xf32> to vector<2x32xf32>
    %cst_11 = arith.constant dense<0.000000e+00> : vector<2xf32>
    %36 = vector.multi_reduction <add>, %35, %cst_11 [1] : vector<2x32xf32> to vector<2xf32>
    %37 = vector.shape_cast %36 : vector<2xf32> to vector<2x1xf32>
    %38 = vector.extract_strided_slice %7 {offsets = [0, 2], sizes = [2, 1], strides = [1, 1]} : vector<2x4xf32> to vector<2x1xf32>
    %39 = math.sqrt %37 : vector<2x1xf32>
    %cst_12 = arith.constant 2.000000e+00 : f32
    %40 = vector.broadcast %cst_12 : f32 to vector<2x1xf32>
    %41 = arith.subf %40, %39 : vector<2x1xf32>
    %cst_13 = arith.constant 0.000000e+00 : f32
    %42 = vector.broadcast %cst_13 : f32 to vector<2x1xf32>
    %43 = arith.maximumf %41, %42 : vector<2x1xf32>
    %44 = arith.mulf %43, %43 : vector<2x1xf32>
    %45 = arith.subf %44, %37 : vector<2x1xf32>
    %46 = arith.mulf %38, %45 : vector<2x1xf32>
    %47 = arith.addf %37, %46 : vector<2x1xf32>
    %48 = arith.addf %34, %47 : vector<2x1xf32>
    %49 = vector.extract_strided_slice %5 {offsets = [0, 96], sizes = [2, 32], strides = [1, 1]} : vector<2x128xf32> to vector<2x32xf32>
    %cst_14 = arith.constant dense<0.000000e+00> : vector<2xf32>
    %50 = vector.multi_reduction <add>, %49, %cst_14 [1] : vector<2x32xf32> to vector<2xf32>
    %51 = vector.shape_cast %50 : vector<2xf32> to vector<2x1xf32>
    %52 = vector.extract_strided_slice %7 {offsets = [0, 3], sizes = [2, 1], strides = [1, 1]} : vector<2x4xf32> to vector<2x1xf32>
    %53 = math.sqrt %51 : vector<2x1xf32>
    %cst_15 = arith.constant 2.000000e+00 : f32
    %54 = vector.broadcast %cst_15 : f32 to vector<2x1xf32>
    %55 = arith.subf %54, %53 : vector<2x1xf32>
    %cst_16 = arith.constant 0.000000e+00 : f32
    %56 = vector.broadcast %cst_16 : f32 to vector<2x1xf32>
    %57 = arith.maximumf %55, %56 : vector<2x1xf32>
    %58 = arith.mulf %57, %57 : vector<2x1xf32>
    %59 = arith.subf %58, %51 : vector<2x1xf32>
    %60 = arith.mulf %52, %59 : vector<2x1xf32>
    %61 = arith.addf %51, %60 : vector<2x1xf32>
    %62 = arith.addf %48, %61 : vector<2x1xf32>
    %63 = vector.shape_cast %62 : vector<2x1xf32> to vector<1x2x1xf32>
    %cst_17 = arith.constant dense<0.000000e+00> : vector<1xf32>
    %64 = vector.multi_reduction <add>, %63, %cst_17 [1, 2] : vector<1x2x1xf32> to vector<1xf32>
    %65 = vector.shape_cast %64 : vector<1xf32> to vector<1x1x1xf32>
    %66 = vector.extract %65[0, 0, 0] : f32 from vector<1x1x1xf32>
    %67 = vector.broadcast %66 : f32 to vector<1x128xf32>
    %c0_18 = arith.constant 0 : index
    %c0_19 = arith.constant 0 : index
    %68 = vector.load %arg4[%c0_18, %c0_19] : memref<1x128xf32, #tpu.memory_space<vmem>>, vector<1x128xf32>
    tpu.vector_store %arg4[%c0_18, %c0_19], %67 {strides = array<i32>} : memref<1x128xf32, #tpu.memory_space<vmem>>, vector<1x128xf32>,
    return
  }
  func.func @transform_0(%arg0: i32) -> (i32, i32) {
    %c0_i32 = arith.constant 0 : i32
    %c0_i32_0 = arith.constant 0 : i32
    return %arg0, %c0_i32 : i32, i32
  }
  func.func @transform_1(%arg0: i32) -> (i32, i32) {
    %c0_i32 = arith.constant 0 : i32
    %c0_i32_0 = arith.constant 0 : i32
    return %arg0, %c0_i32 : i32, i32
  }
  func.func @transform_2(%arg0: i32) -> (i32, i32) {
    %c0_i32 = arith.constant 0 : i32
    %c0_i32_0 = arith.constant 0 : i32
    return %arg0, %c0_i32 : i32, i32
  }
  func.func @transform_3(%arg0: i32) -> (i32, i32) {
    %c0_i32 = arith.constant 0 : i32
    %c0_i32_0 = arith.constant 0 : i32
    return %c0_i32, %arg0 : i32, i32
  }
}

</mosaic_0001>

<bundles_post_ra>
// kernel: tpu_custom_call.1
= control target key start
LH: loop header
LB: loop body
LE: loop exit
PB: predicated region body
PF: predicated region fallthrough
CT: control target
= control target key end

     0   :  { %8 = vsyncpa [#allocation3], 0  ;;  %s276_s0 = inlined_call_operand.hbm [shape: f32[2,128], index: 0, kind: input, shape index: {}]   ;;  %s277_s1 = inlined_call_operand.vmem [shape: f32[2,128], index: 1, kind: input, shape index: {}]   ;;  %s278_s2 = inlined_call_operand.vmem [shape: s32[2,4], index: 2, kind: input, shape index: {}]   ;;  %s279_s3 = inlined_call_operand.hbm [shape: f32[1,128], index: 3, kind: output, shape index: {}]  }
   0x1   :  { %9 = vsyncpa [#allocation4], 0  ;;  %s218_s12 = smov [#allocation2]   ;;  %s170_s16 = scalar_lea.hbm %s276_s0, 32 }
   0x2   :  { %s16_s13 = sshll.u32 %s218_s12, 4  ;;  %p171_p0 = scmp.ne.s32.totalorder %s276_s0, %s170_s16  ;;  %s17_s13 = int_to_ptr.vmem [resolvable:$true] %s16_s13 }
   0x3   :  { %p174_p1 = scmp.lt.u32.totalorder %s170_s16, %s276_s0 }
   0x5   :  { %p176_p2 = pnand %p174_p1, %p171_p0 }
   0x7   :  { %179 = shalt.err (!%p176_p2)
}
   0x8   :  { %s180_s21 = scalar_lea.vmem %s17_s13, 32  ;;  %p185_p4 = scmp.lt.s32.totalorder %s17_s13, %s17_s13 }
   0x9   :  { %p181_p3 = scmp.ne.s32.totalorder %s17_s13, %s180_s21  ;;  %p186_p5 = scmp.lt.s32.totalorder %s180_s21, %s180_s21 }
   0xb   :  { %p187_p6 = por %p186_p5, %p185_p4 }
   0xd   :  { %p188_p7 = pnand %p187_p6, %p181_p3 }
   0xf   :  { %191 = shalt.err (!%p188_p7)
}
  0x10   :  { %19 = dma.hbm_to_vmem [thread:$0]  %s276_s0, 32, %s17_s13, [#allocation3]  }
  0x11   :  { %214 = dma.done.wait [#allocation3], 32  }
  0x12   :  { %215 = vsyncadd [#allocation3], 4294967264  ;;  %v27_v0 = vld [vmem:[#allocation2] sm:$0x3]  ;;  %s219_s26 = smov 96   ;;  %s220_s27 = smov 32  }
  0x13   :  { %v28_v1 = vld [vmem:[%s277_s1] sm:$0x3]  ;;  %s221_s28 = smov 64   ;;  %vm34_vm0 = vcmask 254976   ;;  %s223_s29 = smov 126   ;;  %vm124_vm9 = vcmask 1024  }
  0x14   :  { %v29_v2 = vsub.f32 %v27_v0, %v28_v1  ;;  %v32_v23 = vld [vmem:[%s278_s2] sm:$0x3]  ;;  %s222_s2 = smov 127   ;;  %s224_s30 = smov 125  }
  0x15   :  { %v33_v29 = vcvt.s32.f32 %v32_v23  ;;  %s225_s4 = smov [#allocation5]  }
  0x16   :  { %v30_v3 = vadd.f32 1e-06, %v29_v2  ;;  %s143_s5 = sshll.u32 %s225_s4, 4  ;;  %s144_s5 = int_to_ptr.vmem [resolvable:$true] %s143_s5 }
  0x17   :  { %s192_s7 = scalar_lea.vmem %s144_s5, 16  ;;  %s196_s8 = scalar_lea.vmem %s144_s5, 32 }
  0x18   :  { %v31_v4 = vmul.f32 %v30_v3, %v30_v3  ;;  %p193_p8 = scmp.ne.s32.totalorder %s144_s5, %s192_s7  ;;  %p197_p9 = scmp.lt.s32.totalorder %s144_s5, %s144_s5 }
  0x19   :  { %p198_p10 = scmp.lt.s32.totalorder %s196_s8, %s192_s7 }
  0x1a   :  { %52 = vrot.lane.b32.xlu0 %v31_v4, %s219_s26  ;;  %100 = vrot.lane.b32.xlu1 %v31_v4, %s220_s27  ;;  %v35_v7 = vsel %vm34_vm0, %v31_v4, 0.0 }
  0x1b   :  { %p199_p11 = por %p198_p10, %p197_p9 }
  0x1d   :  { %p200_p12 = pnand %p199_p11, %p193_p8 }
  0x1e   :  { %76 = vrot.lane.b32.xlu0 %v31_v4, %s221_s28 }
  0x8c   :  { %v53_v5 = vpop.permute.xlu0 %52  ;;  %v101_v9 = vpop.permute.xlu1 %100 }
  0x8d   :  { %v55_v6 = vsel %vm34_vm0, %v53_v5, 0.0  ;;  %v103_v11 = vsel %vm34_vm0, %v101_v9, 0.0 }
  0x8e   :  { %56 = vadd.xlane.f32.xlu1 %v55_v6 }
  0x90   :  { %v77_v8 = vpop.permute.xlu0 %76 }
  0x91   :  { %v79_v10 = vsel %vm34_vm0, %v77_v8, 0.0 }
  0x92   :  { %80 = vadd.xlane.f32.xlu0 %v79_v10  ;;  %36 = vadd.xlane.f32.xlu1 %v35_v7 }
  0x96   :  { %104 = vadd.xlane.f32.xlu0 %v103_v11 }
 0x11b   :  { %v57_v12 = vpop.xlane.xlu1 %56 }
 0x11c   :  { %162 = vrsqrt.f32 %v57_v12  ;;  %vm60_vm1 = vcmp.eq.f32.partialorder %v57_v12, inf  ;;  %v63_v17 = vand.u32 2147483648, %v57_v12  ;;  %vm62_vm2 = vcmp.eq.f32.partialorder %v57_v12, 0.0 }
 0x11f   :  { %v81_v13 = vpop.xlane.xlu0 %80  ;;  %v37_v50 = vpop.xlane.xlu1 %36 }
 0x120   :  { %164 = vrsqrt.f32 %v81_v13  ;;  %vm84_vm3 = vcmp.eq.f32.partialorder %v81_v13, inf  ;;  %v87_v24 = vand.u32 2147483648, %v81_v13  ;;  %vm86_vm4 = vcmp.eq.f32.partialorder %v81_v13, 0.0 }
 0x121   :  { %vm40_vm7 = vcmp.eq.f32.partialorder %v37_v50, inf  ;;  %v43_v53 = vand.u32 2147483648, %v37_v50  ;;  %vm42_vm8 = vcmp.eq.f32.partialorder %v37_v50, 0.0 }
 0x123   :  { %v105_v14 = vpop.xlane.xlu0 %104 }
 0x124   :  { %166 = vrsqrt.f32 %v105_v14  ;;  %vm108_vm5 = vcmp.eq.f32.partialorder %v105_v14, inf  ;;  %v111_v33 = vand.u32 2147483648, %v105_v14  ;;  %vm110_vm6 = vcmp.eq.f32.partialorder %v105_v14, 0.0 }
 0x125   :  { %168 = vrsqrt.f32 %v37_v50 }
 0x126   :  { %v163_v15 = vpop.eup %162 }
 0x127   :  { %v59_v16 = vmul.f32 %v163_v15, %v57_v12 }
 0x129   :  { %v61_v18 = vsel %vm60_vm1, %v57_v12, %v59_v16 }
 0x12a   :  { %v165_v19 = vpop.eup %164  ;;  %v64_v20 = vsel %vm62_vm2, %v63_v17, %v61_v18 }
 0x12b   :  { %v65_v21 = vsub.f32 2.0, %v64_v20  ;;  %v83_v22 = vmul.f32 %v165_v19, %v81_v13 }
 0x12d   :  { %v66_v25 = vmax.f32 %v65_v21, 0.0  ;;  %v85_v26 = vsel %vm84_vm3, %v81_v13, %v83_v22 }
 0x12e   :  { %v167_v27 = vpop.eup %166  ;;  %v88_v28 = vsel %vm86_vm4, %v87_v24, %v85_v26 }
 0x12f   :  { %v67_v30 = vmul.f32 %v66_v25, %v66_v25  ;;  %v89_v31 = vsub.f32 2.0, %v88_v28  ;;  %v107_v32 = vmul.f32 %v167_v27, %v105_v14  ;;  %v169_v51 = vpop.eup %168 }
 0x130   :  { %v39_v52 = vmul.f32 %v169_v51, %v37_v50 }
 0x131   :  { %v68_v34 = vsub.f32 %v67_v30, %v57_v12  ;;  %v90_v35 = vmax.f32 %v89_v31, 0.0  ;;  %v109_v36 = vsel %vm108_vm5, %v105_v14, %v107_v32 }
 0x132   :  { %v112_v37 = vsel %vm110_vm6, %v111_v33, %v109_v36  ;;  %v41_v54 = vsel %vm40_vm7, %v37_v50, %v39_v52 }
 0x133   :  { %v69_v38 = vmul.f32 %v68_v34, %v33_v29  ;;  %v91_v39 = vmul.f32 %v90_v35, %v90_v35  ;;  %v113_v40 = vsub.f32 2.0, %v112_v37  ;;  %v44_v55 = vsel %vm42_vm8, %v43_v53, %v41_v54 }
 0x134   :  { %v45_v56 = vsub.f32 2.0, %v44_v55 }
 0x135   :  { %v70_v41 = vadd.f32 %v69_v38, %v57_v12  ;;  %v92_v42 = vsub.f32 %v91_v39, %v81_v13  ;;  %v114_v43 = vmax.f32 %v113_v40, 0.0 }
 0x136   :  { %v46_v57 = vmax.f32 %v45_v56, 0.0 }
 0x137   :  { %72 = vrot.lane.b32.xlu0 %v70_v41, %s222_s2  ;;  %v93_v44 = vmul.f32 %v92_v42, %v33_v29  ;;  %v115_v45 = vmul.f32 %v114_v43, %v114_v43 }
 0x138   :  { %v47_v58 = vmul.f32 %v46_v57, %v46_v57 }
 0x139   :  { %v94_v46 = vadd.f32 %v93_v44, %v81_v13  ;;  %v116_v47 = vsub.f32 %v115_v45, %v105_v14 }
 0x13a   :  { %v48_v59 = vsub.f32 %v47_v58, %v37_v50 }
 0x13b   :  { %96 = vrot.lane.b32.xlu1 %v94_v46, %s223_s29  ;;  %v117_v48 = vmul.f32 %v116_v47, %v33_v29 }
 0x13c   :  { %v49_v60 = vmul.f32 %v48_v59, %v33_v29 }
 0x13d   :  { %v118_v49 = vadd.f32 %v117_v48, %v105_v14 }
 0x13e   :  { %v50_v62 = vadd.f32 %v49_v60, %v37_v50 }
 0x13f   :  { %120 = vrot.lane.b32.xlu1 %v118_v49, %s224_s30 }
 0x1a9   :  { %v73_v61 = vpop.permute.xlu0 %72 }
 0x1aa   :  { %v75_v0 = vadd.f32 %v73_v61, %v50_v62 }
 0x1ad   :  { %v97_v63 = vpop.permute.xlu1 %96 }
 0x1ae   :  { %v99_v1 = vadd.f32 %v97_v63, %v75_v0 }
 0x1b1   :  { %v121_v2 = vpop.permute.xlu1 %120 }
 0x1b2   :  { %v123_v3 = vadd.f32 %v121_v2, %v99_v1 }
 0x1b4   :  { %v125_v4 = vsel %vm124_vm9, %v123_v3, 0.0 }
 0x1b5   :  { %126 = vadd.xlane.f32.xlu0 %v125_v4 }
 0x242   :  { %v127_v5 = vpop.xlane.xlu0 %126 }
 0x243   :  { %v128_v6 = vrot.slane %v127_v5, 4 }
 0x245   :  { %v129_v7 = vadd.f32 %v128_v6, %v127_v5 }
 0x247   :  { %v130_v8 = vrot.slane %v129_v7, 2 }
 0x249   :  { %v131_v9 = vadd.f32 %v130_v8, %v129_v7 }
 0x24b   :  { %v132_v10 = vrot.slane %v131_v9, 1 }
 0x24d   :  { %v133_v11 = vadd.f32 %v132_v10, %v131_v9 }
 0x24f   :  { %152 = vpush %v133_v11 }
 0x280   :  { %s153_s6 = spop %152 }
 0x281   :  { %v135_v12 = vstv %s153_s6 }
 0x282   :  { %136 = vst [vmem:[#allocation5] sm:$0x1] %v135_v12 }
 0x283   :  { %203 = shalt.err (!%p200_p12)
}
 0x284   :  { %s204_s11 = scalar_lea.hbm %s279_s3, 16 }
 0x285   :  { %p205_p13 = scmp.ne.s32.totalorder %s279_s3, %s204_s11  ;;  %p208_p0 = scmp.lt.u32.totalorder %s204_s11, %s279_s3 }
 0x287   :  { %p210_p1 = pnand %p208_p0, %p205_p13 }
 0x289   :  { %213 = shalt.err (!%p210_p1)
}
 0x28a   :  { %146 = dma.vmem_to_hbm [thread:$0]  %s144_s5, 16, %s279_s3, [#allocation4]  }
 0x28b   :  { %216 = dma.done.wait [#allocation4], 16  }
 0x28c   :  { %217 = vsyncadd [#allocation4], 4294967280 }
 0x28d   :  { %150 = vsyncpa [#allocation3], 1 }
 0x28e   :  { %151 = vsyncpa [#allocation4], 1 }

</bundles_post_ra>
